<compile_context>
chip_gen: v7x
topology: tpu7x:2x2x1
jax: 0.10.0
libtpu: 0.0.40
codegen_flags: <defaults>
</compile_context>

<pallas_src>
import jax
import jax.numpy as jnp
from jax.experimental import pallas as pl
from jax.experimental.pallas import tpu as pltpu


def _normalize_kernel(mean_ref, inv_ref, x_ref, o_ref):
    # mean_ref / inv_ref: VMEM (1, C, 1) f32 — broadcast over batch-block & lanes.
    # x_ref / o_ref:      VMEM (Bb, C, H*W) — lane-dense last dim.
    x = x_ref[...].astype(jnp.float32)
    y = (x - mean_ref[...]) * inv_ref[...]      # subtract + multiply: pure VPU
    o_ref[...] = y.astype(o_ref.dtype)


def _pick_batch_block(B: int, per_item_bytes: int, target_bytes: int = 2 << 20) -> int:
    """Largest divisor of B whose block stays near `target_bytes`, while keeping
    >= 2 grid steps when possible (megacore sharding on v7x)."""
    bb = max(1, min(B, target_bytes // max(per_item_bytes, 1)))
    if B >= 2:
        bb = max(1, min(bb, B // 2))
    while B % bb != 0:
        bb -= 1
    return bb


def policy_normalize(x: jax.Array, mean: jax.Array, std: jax.Array) -> jax.Array:
    """(x - mean[:, None, None]) / std[:, None, None] for NCHW x."""
    B, C, H, W = x.shape
    L = H * W
    out_dtype = jnp.result_type(x.dtype, mean.dtype)

    # Lane-dense layout + precomputed reciprocal (reshapes are metadata-only).
    x3 = x.reshape(B, C, L)
    mean3 = mean.astype(jnp.float32).reshape(1, C, 1)
    inv3 = (1.0 / std.astype(jnp.float32)).reshape(1, C, 1)

    itemsize_in = jnp.dtype(x.dtype).itemsize
    itemsize_out = jnp.dtype(out_dtype).itemsize
    bb = _pick_batch_block(B, C * L * max(itemsize_in, itemsize_out))

    # Double-buffered in + out blocks (+ slack). Only raise the scoped VMEM
    # limit when the block actually requires it.
    blk_bytes = bb * C * L * (itemsize_in + itemsize_out)
    vmem_need = 2 * blk_bytes + (1 << 20)
    cp_kwargs = dict(dimension_semantics=("parallel",))
    if vmem_need > (24 << 20):
        cp_kwargs["vmem_limit_bytes"] = int(min(vmem_need + (4 << 20), 100 << 20))

    out3 = pl.pallas_call(
        _normalize_kernel,
        out_shape=jax.ShapeDtypeStruct((B, C, L), out_dtype),
        grid=(B // bb,),
        in_specs=[
            pl.BlockSpec((1, C, 1), lambda i: (0, 0, 0)),    # mean  (resident)
            pl.BlockSpec((1, C, 1), lambda i: (0, 0, 0)),    # 1/std (resident)
            pl.BlockSpec((bb, C, L), lambda i: (i, 0, 0)),   # x block
        ],
        out_specs=pl.BlockSpec((bb, C, L), lambda i: (i, 0, 0)),
        compiler_params=pltpu.CompilerParams(**cp_kwargs),
    )(mean3, inv3, x3)

    return out3.reshape(B, C, H, W)


class Policy:
    """Minimal JAX mirror of the PyTorch Policy module (eval / pil_mode path).

    Per-stage weights (`_weights = ones(num_operations)`) are kept so the module
    shape matches the PyTorch __init__, but they only influence the
    (non-kernelized) stochastic training branch.
    """

    def __init__(self, num_operations: int, num_sub_policies: int,
                 temperature: float = 1.0, operation_count: int = 2,
                 num_chunks: int = 4, mean=None, std=None):
        self.num_sub_policies = num_sub_policies
        self.temperature = temperature
        self.operation_count = operation_count
        self.num_chunks = num_chunks
        self.stage_weights = [
            [jnp.ones((num_operations,), jnp.float32) for _ in range(operation_count)]
            for _ in range(num_sub_policies)
        ]
        self._mean = mean
        self._std = std
        self.training = False  # eval mode

    def normalize(self, x):
        return policy_normalize(x, self._mean, self._std)

    def __call__(self, x):
        # Eval / pil_mode path of Policy.forward: just normalize.
        # TODO(synk): training-mode chunked random sub-policy application omitted.
        return self.normalize(x)


if __name__ == "__main__":
    key = jax.random.PRNGKey(0)
    k_x, k_m, k_s = jax.random.split(key, 3)

    B, C, H, W = 2, 4, 16, 16
    x = jax.random.normal(k_x, (B, C, H, W), dtype=jnp.float32)
    mean = jax.random.normal(k_m, (C,), dtype=jnp.float32) * 0.1 + 0.5
    std = jax.random.uniform(k_s, (C,), dtype=jnp.float32, minval=0.5, maxval=1.5)

    policy = Policy(num_operations=14, num_sub_policies=1,
                    temperature=1.0, operation_count=2, num_chunks=4,
                    mean=mean, std=std)

    out = policy(x)
    out = jax.block_until_ready(out)

    # sanity check against pure-JAX reference (divide; kernel uses recip-mul)
    ref = (x - mean[None, :, None, None]) / std[None, :, None, None]
    assert out.shape == x.shape and out.dtype == ref.dtype
    assert jnp.allclose(out, ref, atol=1e-5, rtol=1e-5)

    print("KERNEL_OK")
</pallas_src>

<mosaic_0001>
module attributes {stable_mosaic.version = 11 : i64} {
  func.func @_normalize_kernel(%arg0: i32, %arg1: memref<1x4x1xf32, #tpu.memory_space<vmem>>, %arg2: memref<1x4x1xf32, #tpu.memory_space<vmem>>, %arg3: memref<1x4x256xf32, #tpu.memory_space<vmem>>, %arg4: memref<1x4x256xf32, #tpu.memory_space<vmem>>) attributes {dimension_semantics = [#tpu.dimension_semantics<parallel>], iteration_bounds = array<i64: 2>, scalar_prefetch = 0 : i64, scratch_operands = 0 : i64, tpu.core_type = #tpu.core_type<tc>, window_params = [{pipeline_mode = #tpu.pipeline_mode<synchronous>, transform_indices = @transform_0, window_bounds = array<i64: 1, 4, 1>}, {pipeline_mode = #tpu.pipeline_mode<synchronous>, transform_indices = @transform_1, window_bounds = array<i64: 1, 4, 1>}, {transform_indices = @transform_2, window_bounds = array<i64: 1, 4, 256>}, {transform_indices = @transform_3, window_bounds = array<i64: 1, 4, 256>}]} {
    %c0 = arith.constant 0 : index
    %c0_0 = arith.constant 0 : index
    %c0_1 = arith.constant 0 : index
    %0 = vector.load %arg3[%c0, %c0_0, %c0_1] : memref<1x4x256xf32, #tpu.memory_space<vmem>>, vector<1x4x256xf32>
    %c0_2 = arith.constant 0 : index
    %c0_3 = arith.constant 0 : index
    %c0_4 = arith.constant 0 : index
    %1 = vector.load %arg1[%c0_2, %c0_3, %c0_4] : memref<1x4x1xf32, #tpu.memory_space<vmem>>, vector<1x4x1xf32>
    %2 = vector.broadcast %1 : vector<1x4x1xf32> to vector<1x4x256xf32>
    %3 = arith.subf %0, %2 : vector<1x4x256xf32>
    %c0_5 = arith.constant 0 : index
    %c0_6 = arith.constant 0 : index
    %c0_7 = arith.constant 0 : index
    %4 = vector.load %arg2[%c0_5, %c0_6, %c0_7] : memref<1x4x1xf32, #tpu.memory_space<vmem>>, vector<1x4x1xf32>
    %5 = vector.broadcast %4 : vector<1x4x1xf32> to vector<1x4x256xf32>
    %6 = arith.mulf %3, %5 : vector<1x4x256xf32>
    %c0_8 = arith.constant 0 : index
    %c0_9 = arith.constant 0 : index
    %c0_10 = arith.constant 0 : index
    %7 = vector.load %arg4[%c0_8, %c0_9, %c0_10] : memref<1x4x256xf32, #tpu.memory_space<vmem>>, vector<1x4x256xf32>
    tpu.vector_store %arg4[%c0_8, %c0_9, %c0_10], %6 {strides = array<i32>} : memref<1x4x256xf32, #tpu.memory_space<vmem>>, vector<1x4x256xf32>,
    return
  }
  func.func @transform_0(%arg0: i32) -> (i32, i32, i32) {
    %c0_i32 = arith.constant 0 : i32
    %c0_i32_0 = arith.constant 0 : i32
    %c0_i32_1 = arith.constant 0 : i32
    %c0_i32_2 = arith.constant 0 : i32
    return %c0_i32, %c0_i32_0, %c0_i32_1 : i32, i32, i32
  }
  func.func @transform_1(%arg0: i32) -> (i32, i32, i32) {
    %c0_i32 = arith.constant 0 : i32
    %c0_i32_0 = arith.constant 0 : i32
    %c0_i32_1 = arith.constant 0 : i32
    %c0_i32_2 = arith.constant 0 : i32
    return %c0_i32, %c0_i32_0, %c0_i32_1 : i32, i32, i32
  }
  func.func @transform_2(%arg0: i32) -> (i32, i32, i32) {
    %c0_i32 = arith.constant 0 : i32
    %c0_i32_0 = arith.constant 0 : i32
    %c0_i32_1 = arith.constant 0 : i32
    return %arg0, %c0_i32, %c0_i32_0 : i32, i32, i32
  }
  func.func @transform_3(%arg0: i32) -> (i32, i32, i32) {
    %c0_i32 = arith.constant 0 : i32
    %c0_i32_0 = arith.constant 0 : i32
    %c0_i32_1 = arith.constant 0 : i32
    return %arg0, %c0_i32, %c0_i32_0 : i32, i32, i32
  }
}

</mosaic_0001>

<bundles_post_ra>
// kernel: tpu_custom_call.1
= control target key start
LH: loop header
LB: loop body
LE: loop exit
PB: predicated region body
PF: predicated region fallthrough
CT: control target
= control target key end

     0   :  { %8 = vsyncpa [#allocation3], 0  ;;  %s522_s0 = inlined_call_operand.vmem [shape: f32[1,4,1], index: 0, kind: input, shape index: {}]   ;;  %s523_s1 = inlined_call_operand.vmem [shape: f32[1,4,1], index: 1, kind: input, shape index: {}]   ;;  %s524_s2 = inlined_call_operand.vmem [shape: f32[2,4,256], index: 2, kind: input, shape index: {}]   ;;  %s525_s3 = inlined_call_operand.hbm [shape: f32[2,4,256], index: 3, kind: output, shape index: {}]  }
   0x1   :  { %10 = vsyncpa [#allocation3 + $0x1], 0  ;;  %s416_s12 = smov 0   ;;  %s418_s13 = smov 0  }
   0x2   :  { %s420_s14 = smov 0   ;;  %s422_s15 = smov 0  }
   0x3 LB: > { %s437_s16 = sadd.s32 4294967295, %s391_s15   ;;  %s273_s17 = sadd.s32 4294967294, %s391_s15   ;;  %s391_s15 = sphi %s422_s15, %s531_s15   ;;  %s387_s14 = sphi %s420_s14, %s530_s14   ;;  %s383_s13 = sphi %s418_s13, %s529_s13   ;;  %s379_s12 = sphi %s416_s12, %s528_s12  }
   0x4   : > { %s441_s18 = sadd.s32 1, %s391_s15   ;;  %s91_s19 = sadd.s32 1, %s387_s14 }
   0x5   : > { %s88_s20 = ssub.s32 %s391_s15, %s441_s18  ;;  %p101_p0 = scmp.ne.s32.totalorder %s387_s14, %s383_s13 }
   0x6   : > { %p89_p1 = scmp.eq.s32.totalorder %s88_s20, 0  ;;  %p102_p2 = scmp.eq.s32.totalorder %s437_s16, 1 }
   0x7   : > { %p107_p3 = scmp.ne.s32.totalorder %s383_s13, %s379_s12  ;;  %p108_p4 = scmp.eq.s32.totalorder %s273_s17, 1 }
   0x8   : > { %s452_s21 = scalar_select %p89_p1, %s387_s14, %s91_s19  }
   0x9   : > { %p454_p5 = por %p102_p2, %p101_p0  ;;  %p458_p6 = por %p108_p4, %p107_p3 }
   0xa   : > { %p276_p7 = scmp.ge.s32.totalorder %s391_s15, 1  ;;  %p140_p8 = scmp.lt.s32.totalorder %s391_s15, 3 }
   0xc   : > { %p141_p9 = pnand %p276_p7, %p140_p8 }
   0xd   : > { %v170_v0 = vld [vmem:[%s522_s0] sm:$0xf] (!%p141_p9)  ;;  %v393_v1 = vmov (!%p141_p9), 0   ;;  %p164_p10 = scmp.lt.s32.totalorder (!%p141_p9), %s437_s16, 1  ;;  %v394_v3 = vmov (!%p141_p9), 839922192   ;;  %v178_v5 = vlaneseq (!%p141_p9) }
   0xe   : > { %144 = sbr.rel (%p141_p9) target bundleno = 165 (0xa5), region = 32  ;;  %328 = vset.pattern.permute.xlu0 (!%p141_p9), %v393_v1  ;;  %v184_v2 = vld [vmem:[%s523_s1] sm:$0xf] (!%p141_p9)  ;;  %v176_v4 = vunpack.c.l.s4 (!%p141_p9), %v394_v3  ;;  %s161_s29 = sand.u32 (!%p141_p9), 1, %s383_s13  }
   0xf   : > { %173 = vperm.xlu0 (!%p141_p9), %328, %v170_v0   ;;  %v179_v7 = vshrl.u32 (!%p141_p9), %v178_v5, 7  ;;  %s277_s4 = sshll.u32 (!%p141_p9), %s161_s29, 3  ;;  %s286_s8 = sshll.u32 (!%p141_p9), %s437_s16, 7 }
  0x10   : > { %v177_v6 = vunpack.c.0.s8 (!%p141_p9), %v176_v4  ;;  %s163_s9 = scalar_lea.vmem (!%p141_p9), [#allocation2], %s277_s4  ;;  %s480_s19 = scalar_lea.hbm (!%p141_p9), %s525_s3, %s286_s8 }
  0x11   : > { %s214_s10 = sshll.u32 (!%p141_p9), %s163_s9, 4  ;;  %s200_s20 = scalar_lea.sflag (!%p141_p9), [#allocation3], %s161_s29  ;;  %s482_s10 = int_to_ptr.vmem [resolvable:$true] %s214_s10 }
  0x12   : > { %v180_v8 = vsub.s32 (!%p141_p9), %v177_v6, %v179_v7  ;;  %s329_s24 = scalar_lea.vmem (!%p141_p9), %s482_s10, 128 }
  0x13   : > { %187 = vperm.xlu0 (!%p141_p9), %328, %v184_v2   ;;  %p330_p11 = scmp.ne.s32.totalorder (!%p141_p9), %s482_s10, %s329_s24 }
  0x15   : > { %s165_s28 = scalar_select %p164_p10, %s437_s16, 1 }
  0x16   : > { %p331_p12 = pnand %p330_p11, %p454_p5  ;;  %s395_s16 = smov [#allocation2]  }
  0x17   : > { %s285_s30 = sshll.u32 %s165_s28, 3  ;;  %s333_s25 = sshll.u32 %s395_s16, 4  ;;  %s334_s25 = int_to_ptr.vmem [resolvable:$false] %s333_s25 }
  0x18   : > { %s168_s7 = scalar_lea.vmem %s524_s2, %s285_s30  ;;  %p332_p13 = pneg %p331_p12 }
  0x19   : > { %v169_v11 = vld [vmem:[%s168_s7] sm:$0xff]  ;;  %s335_s26 = scalar_lea.vmem %s334_s25, 256  ;;  %p336_p0 = scmp.lt.s32.totalorder %s482_s10, %s334_s25 }
  0x1a   : > { %p337_p1 = scmp.lt.s32.totalorder %s335_s26, %s329_s24 }
  0x1c   : > { %p338_p2 = por %p337_p1, %p336_p0 }
  0x1e   : > { %p339_p3 = pnand %p338_p2, %p332_p13 }
  0x8e   : > { %v174_v9 = vpop.permute.xlu0 %173 }
  0x8f   : > { %v181_v10 = vrot.slane %v174_v9, %v180_v8 }
  0x91   : > { %v183_v13 = vsub.f32 %v169_v11, %v181_v10 }
  0x92   : > { %v188_v12 = vpop.permute.xlu0 %187 }
  0x93   : > { %v195_v14 = vrot.slane %v188_v12, %v180_v8 }
  0x95   : > { %v197_v15 = vmul.f32 %v195_v14, %v183_v13 }
  0x97   : > { %198 = vst [vmem:[%s163_s9] sm:$0xff] %v197_v15 }
  0x98   : > { %342 = shalt.err (!%p339_p3)
}
  0x99   : > { %s343_s27 = scalar_lea.hbm %s480_s19, 128  ;;  %s347_s30 = scalar_lea.hbm %s525_s3, 256 }
  0x9a   : > { %p344_p4 = scmp.ne.s32.totalorder %s480_s19, %s343_s27  ;;  %p348_p9 = scmp.lt.u32.totalorder %s480_s19, %s525_s3 }
  0x9b   : > { %p349_p10 = scmp.lt.u32.totalorder %s347_s30, %s343_s27  ;;  %p351_p12 = scmp.lt.u32.totalorder %s343_s27, %s480_s19 }
  0x9c   : > { %p345_p7 = pnand %p344_p4, %p454_p5 }
  0x9d   : > { %p350_p11 = por %p349_p10, %p348_p9 }
  0x9e   : > { %p346_p8 = pneg %p345_p7 }
  0x9f   : > { %p352_p13 = por %p351_p12, %p350_p11 }
  0xa1   : > { %p353_p0 = pnand %p352_p13, %p346_p8 }
  0xa3   : > { %356 = shalt.err (!%p353_p0)
}
  0xa4   : > { %287 = dma.vmem_to_hbm [thread:$0]  (%p454_p5), %s482_s10, 128, %s480_s19, %s200_s20  }
  0xa5 PF: > { %p293_p1 = scmp.ge.s32.totalorder %s391_s15, 2  ;;  %s226_s6 = sand.u32 1, %s379_s12  }
  0xa6   : > { %s227_s7 = scalar_lea.sflag [#allocation3], %s226_s6 }
  0xa7   : > { %p290_p2 = pnand %p293_p1, %p458_p6 }
  0xa9   : > { %374 = dma.done.wait (!%p290_p2), %s227_s7, 128  }
  0xaa   : > { %376 = vsyncadd (!%p290_p2), %s227_s7, 4294967168  ;;  %p13_p3 = scmp.ge.s32.totalorder %s441_s18, 4   ;;  %s528_s12 = smov %s383_s13 }
  0xab   : > { %s529_s13 = smov %s387_s14  ;;  %s530_s14 = smov %s452_s21 }
  0xac   : > { %s531_s15 = smov %s441_s18  ;;  %15 = sbr.rel (!%p13_p3) target bundleno = 3 (0x3), region = 67 }
  0xb3   :  { %232 = vsyncpa [#allocation3], 1 }
  0xb4   :  { %234 = vsyncpa [#allocation3 + $0x1], 1 }

</bundles_post_ra>
